<compile_context>
chip_gen: v6e
topology: v6e:2x2x1
jax: 0.10.0
libtpu: 0.0.40
codegen_flags: <defaults>
</compile_context>

<pallas_src>
import functools

import jax
import jax.numpy as jnp
from jax.experimental import pallas as pl
from jax.experimental.pallas import tpu as pltpu

N_DIGITS = 4
NUM_CLASSES = 10
_LANE = 128


def _round_up(x, m):
    return (x + m - 1) // m * m


def _ce_sum_kernel(logits_ref, labels_ref, out_ref, acc_ref, *, inv_count):
    # logits_ref: (C, T) f32 VMEM  -- classes on sublanes, samples on lanes
    # labels_ref: (1, T) i32 VMEM  -- padded samples carry label = -1
    # out_ref   : (1, 1) f32 SMEM  -- final mean loss (written on last step)
    # acc_ref   : (1, 1) f32 SMEM scratch -- running sum across grid steps
    pid = pl.program_id(0)

    @pl.when(pid == 0)
    def _():
        acc_ref[0, 0] = jnp.float32(0.0)

    logits = logits_ref[...]                                    # (C, T) f32
    labels = labels_ref[...]                                    # (1, T) i32

    # Numerically stable logsumexp over the class (sublane) axis.
    m = jnp.max(logits, axis=0, keepdims=True)                  # (1, T)
    lse = m + jnp.log(jnp.sum(jnp.exp(logits - m), axis=0, keepdims=True))

    # One-hot gather of the target logit (VPU compare + select + sum; no MXU).
    cls = jax.lax.broadcasted_iota(jnp.int32, logits.shape, 0)  # (C, T)
    tgt = jnp.sum(jnp.where(cls == labels, logits, 0.0), axis=0, keepdims=True)

    # Mask out lane-padding samples (label < 0).
    # TODO(synk): PyTorch raises on labels outside [0, 10); here they are silently masked.
    valid = (labels >= 0).astype(jnp.float32)
    acc_ref[0, 0] += jnp.sum((lse - tgt) * valid)

    @pl.when(pid == pl.num_programs(0) - 1)
    def _():
        out_ref[0, 0] = acc_ref[0, 0] * inv_count


def n_cross_entropy_loss(output, label, n=N_DIGITS, max_tile=4096):
    """output: (B, 10*n) float logits, label: (B, n) int labels. Returns scalar f32."""
    B = output.shape[0]
    N = n * B

    # Mean CE is invariant to row order, so skip the torch.cat digit-major permutation:
    # contiguous reshapes are free and rows/labels still correspond 1:1.
    logits = output.reshape(N, NUM_CLASSES).astype(jnp.float32)   # (N, 10)
    labels_row = label.astype(jnp.int32).reshape(1, N)            # (1, N)

    # Lane-dense layout: classes on sublanes (10 -> 16 pad), samples on lanes.
    logits_t = logits.T                                           # (10, N)

    tile = min(_round_up(max_tile, _LANE), _round_up(N, _LANE))
    n_pad = _round_up(N, tile)
    pad = n_pad - N
    if pad:
        logits_t = jnp.pad(logits_t, ((0, 0), (0, pad)))
        labels_row = jnp.pad(labels_row, ((0, 0), (0, pad)), constant_values=-1)

    grid = (n_pad // tile,)
    kernel = functools.partial(_ce_sum_kernel, inv_count=1.0 / N)

    loss = pl.pallas_call(
        kernel,
        out_shape=jax.ShapeDtypeStruct((1, 1), jnp.float32),
        grid_spec=pltpu.PrefetchScalarGridSpec(
            num_scalar_prefetch=0,
            grid=grid,
            in_specs=[
                pl.BlockSpec((NUM_CLASSES, tile), lambda i: (0, i)),
                pl.BlockSpec((1, tile), lambda i: (0, i)),
            ],
            out_specs=pl.BlockSpec(
                (1, 1), lambda i: (0, 0), memory_space=pltpu.MemorySpace.SMEM
            ),
            scratch_shapes=[pltpu.SMEM((1, 1), jnp.float32)],
        ),
        compiler_params=pltpu.CompilerParams(
            dimension_semantics=("arbitrary",),
        ),
    )(logits_t, labels_row)
    return loss[0, 0]


def _reference_loss(output, label, n=N_DIGITS):
    B = output.shape[0]
    logits = output.reshape(B, n, NUM_CLASSES).astype(jnp.float32)   # (B, n, 10)
    logp = jax.nn.log_softmax(logits, axis=-1)
    lbl = label.astype(jnp.int32)                                    # (B, n)
    picked = jnp.take_along_axis(logp, lbl[..., None], axis=-1)[..., 0]
    return -jnp.mean(picked)


if __name__ == "__main__":
    key = jax.random.PRNGKey(0)
    k1, k2 = jax.random.split(key)

    # Captcha-sized example (matches the PyTorch module: 4 digits x 10 classes).
    B = 2
    output = jax.random.normal(k1, (B, NUM_CLASSES * N_DIGITS), dtype=jnp.float32)
    label = jax.random.randint(k2, (B, N_DIGITS), 0, NUM_CLASSES, dtype=jnp.int32)

    loss = n_cross_entropy_loss(output, label)
    loss = jax.block_until_ready(loss)
    ref = _reference_loss(output, label)
    assert jnp.allclose(loss, ref, rtol=1e-5, atol=1e-5), (loss, ref)

    # Second small check exercising the multi-step grid / accumulator path.
    k3, k4 = jax.random.split(k2)
    B2 = 64                                    # N = 256 samples, tile = 128 -> 2 grid steps
    output2 = jax.random.normal(k3, (B2, NUM_CLASSES * N_DIGITS), dtype=jnp.float32)
    label2 = jax.random.randint(k4, (B2, N_DIGITS), 0, NUM_CLASSES, dtype=jnp.int32)
    loss2 = jax.block_until_ready(n_cross_entropy_loss(output2, label2, max_tile=128))
    ref2 = _reference_loss(output2, label2)
    assert jnp.allclose(loss2, ref2, rtol=1e-5, atol=1e-5), (loss2, ref2)

    print("KERNEL_OK")
</pallas_src>

<mosaic_0001>
module attributes {stable_mosaic.version = 11 : i64} {
  func.func @_ce_sum_kernel(%arg0: i32, %arg1: memref<10x128xf32, #tpu.memory_space<vmem>>, %arg2: memref<1x128xi32, #tpu.memory_space<vmem>>, %arg3: memref<1x1xf32, #tpu.memory_space<smem>>, %arg4: memref<1x1xf32, #tpu.memory_space<smem>>) attributes {dimension_semantics = [#tpu.dimension_semantics<arbitrary>], iteration_bounds = array<i64: 1>, scalar_prefetch = 0 : i64, scratch_operands = 1 : i64, tpu.core_type = #tpu.core_type<tc>, window_params = [{transform_indices = @transform_0, window_bounds = array<i64: 10, 128>}, {transform_indices = @transform_1, window_bounds = array<i64: 1, 128>}, {transform_indices = @transform_2, window_bounds = array<i64: 1, 1>}]} {
    %c0_i32 = arith.constant 0 : i32
    %0 = arith.cmpi eq, %arg0, %c0_i32 : i32
    %1 = arith.extui %0 : i1 to i32
    %c0_i32_0 = arith.constant 0 : i32
    %2 = arith.cmpi ne, %1, %c0_i32_0 : i32
    scf.if %2 {
      %cst_15 = arith.constant 0.000000e+00 : f32
      %c0_16 = arith.constant 0 : index
      %c0_17 = arith.constant 0 : index
      %37 = memref.load %arg4[%c0_16, %c0_17] : memref<1x1xf32, #tpu.memory_space<smem>>
      memref.store %cst_15, %arg4[%c0_16, %c0_17] : memref<1x1xf32, #tpu.memory_space<smem>>
    } else {
    }
    %c0 = arith.constant 0 : index
    %c0_1 = arith.constant 0 : index
    %3 = vector.load %arg1[%c0, %c0_1] : memref<10x128xf32, #tpu.memory_space<vmem>>, vector<10x128xf32>
    %c0_2 = arith.constant 0 : index
    %c0_3 = arith.constant 0 : index
    %4 = vector.load %arg2[%c0_2, %c0_3] : memref<1x128xi32, #tpu.memory_space<vmem>>, vector<1x128xi32>
    %cst = arith.constant dense<0xFF800000> : vector<128xf32>
    %5 = vector.multi_reduction <maximumf>, %3, %cst [0] : vector<10x128xf32> to vector<128xf32>
    %6 = vector.shape_cast %5 : vector<128xf32> to vector<1x128xf32>
    %7 = vector.broadcast %6 : vector<1x128xf32> to vector<10x128xf32>
    %8 = arith.subf %3, %7 : vector<10x128xf32>
    %9 = math.exp %8 : vector<10x128xf32>
    %cst_4 = arith.constant dense<0.000000e+00> : vector<128xf32>
    %10 = vector.multi_reduction <add>, %9, %cst_4 [0] : vector<10x128xf32> to vector<128xf32>
    %11 = vector.shape_cast %10 : vector<128xf32> to vector<1x128xf32>
    %12 = math.log %11 : vector<1x128xf32>
    %13 = arith.addf %6, %12 : vector<1x128xf32>
    %14 = tpu.iota {dimensions = array<i32: 0>} : vector<10x128xi32>
    %15 = vector.broadcast %4 : vector<1x128xi32> to vector<10x128xi32>
    %16 = arith.cmpi eq, %14, %15 : vector<10x128xi32>
    %cst_5 = arith.constant 0.000000e+00 : f32
    %17 = vector.broadcast %cst_5 : f32 to vector<10x128xf32>
    %18 = arith.select %16, %3, %17 : vector<10x128xi1>, vector<10x128xf32>
    %cst_6 = arith.constant dense<0.000000e+00> : vector<128xf32>
    %19 = vector.multi_reduction <add>, %18, %cst_6 [0] : vector<10x128xf32> to vector<128xf32>
    %20 = vector.shape_cast %19 : vector<128xf32> to vector<1x128xf32>
    %c0_i32_7 = arith.constant 0 : i32
    %21 = vector.broadcast %c0_i32_7 : i32 to vector<1x128xi32>
    %22 = arith.cmpi sge, %4, %21 : vector<1x128xi32>
    %23 = arith.extui %22 : vector<1x128xi1> to vector<1x128xi32>
    %24 = arith.sitofp %23 : vector<1x128xi32> to vector<1x128xf32>
    %c0_8 = arith.constant 0 : index
    %c0_9 = arith.constant 0 : index
    %25 = memref.load %arg4[%c0_8, %c0_9] : memref<1x1xf32, #tpu.memory_space<smem>>
    %26 = arith.subf %13, %20 : vector<1x128xf32>
    %27 = arith.mulf %26, %24 : vector<1x128xf32>
    %28 = vector.shape_cast %27 : vector<1x128xf32> to vector<1x1x128xf32>
    %cst_10 = arith.constant dense<0.000000e+00> : vector<1xf32>
    %29 = vector.multi_reduction <add>, %28, %cst_10 [1, 2] : vector<1x1x128xf32> to vector<1xf32>
    %30 = vector.shape_cast %29 : vector<1xf32> to vector<1x1x1xf32>
    %31 = vector.extract %30[0, 0, 0] : f32 from vector<1x1x1xf32>
    %32 = arith.addf %25, %31 : f32
    %c0_11 = arith.constant 0 : index
    %c0_12 = arith.constant 0 : index
    %33 = memref.load %arg4[%c0_11, %c0_12] : memref<1x1xf32, #tpu.memory_space<smem>>
    memref.store %32, %arg4[%c0_11, %c0_12] : memref<1x1xf32, #tpu.memory_space<smem>>
    %c0_i32_13 = arith.constant 0 : i32
    %34 = arith.cmpi eq, %arg0, %c0_i32_13 : i32
    %35 = arith.extui %34 : i1 to i32
    %c0_i32_14 = arith.constant 0 : i32
    %36 = arith.cmpi ne, %35, %c0_i32_14 : i32
    scf.if %36 {
      %c0_15 = arith.constant 0 : index
      %c0_16 = arith.constant 0 : index
      %37 = memref.load %arg4[%c0_15, %c0_16] : memref<1x1xf32, #tpu.memory_space<smem>>
      %cst_17 = arith.constant 1.250000e-01 : f32
      %38 = arith.mulf %37, %cst_17 : f32
      %c0_18 = arith.constant 0 : index
      %c0_19 = arith.constant 0 : index
      %39 = memref.load %arg3[%c0_18, %c0_19] : memref<1x1xf32, #tpu.memory_space<smem>>
      memref.store %38, %arg3[%c0_18, %c0_19] : memref<1x1xf32, #tpu.memory_space<smem>>
    } else {
    }
    return
  }
  func.func @transform_0(%arg0: i32) -> (i32, i32) {
    %c0_i32 = arith.constant 0 : i32
    %c0_i32_0 = arith.constant 0 : i32
    return %c0_i32, %arg0 : i32, i32
  }
  func.func @transform_1(%arg0: i32) -> (i32, i32) {
    %c0_i32 = arith.constant 0 : i32
    %c0_i32_0 = arith.constant 0 : i32
    return %c0_i32, %arg0 : i32, i32
  }
  func.func @transform_2(%arg0: i32) -> (i32, i32) {
    %c0_i32 = arith.constant 0 : i32
    %c0_i32_0 = arith.constant 0 : i32
    %c0_i32_1 = arith.constant 0 : i32
    return %c0_i32, %c0_i32_0 : i32, i32
  }
}

</mosaic_0001>

<bundles_post_ra>
// kernel: tpu_custom_call.1
= control target key start
LH: loop header
LB: loop body
LE: loop exit
PB: predicated region body
PF: predicated region fallthrough
CT: control target
= control target key end

     0   :  { %7 = vsyncpa [#allocation4], 0  ;;  %s199_s0 = inlined_call_operand.hbm [shape: f32[10,128], index: 0, kind: input, shape index: {}]   ;;  %s200_s1 = inlined_call_operand.vmem [shape: s32[1,128], index: 1, kind: input, shape index: {}]   ;;  %s201_s2 = inlined_call_operand.hbm [shape: f32[1,1], index: 2, kind: output, shape index: {}]  }
   0x1   :  { %8 = vsyncpa [#allocation5], 0  ;;  %s167_s9 = smov [#allocation3]  }
   0x2   :  { %s14_s10 = sshll.u32 %s167_s9, 4  ;;  %s15_s10 = int_to_ptr.vmem [resolvable:$true] %s14_s10 }
   0x3   :  { %s143_s11 = scalar_lea.vmem %s15_s10, 256  ;;  %p148_p1 = scmp.lt.s32.totalorder %s15_s10, %s15_s10 }
   0x4   :  { %p144_p0 = scmp.ne.s32.totalorder %s15_s10, %s143_s11  ;;  %p149_p2 = scmp.lt.s32.totalorder %s143_s11, %s143_s11 }
   0x6   :  { %p150_p3 = por %p149_p2, %p148_p1 }
   0x8   :  { %p151_p4 = pnand %p150_p3, %p144_p0 }
   0xa   :  { %154 = shalt.err (!%p151_p4)
}
   0xb   :  { %s168_s12 = smov 128   ;;  %s169_s13 = smov 8  }
   0xc   :  { %20 = dma.hbm_to_vmem [thread:$0]  %s199_s0, 256, %s15_s10, [#allocation4], %s168_s12, %s168_s12, %s169_s13  }
   0xd   :  { %163 = dma.done.wait [#allocation4], 256  }
   0xe   :  { %164 = vsyncadd [#allocation4], 4294967040  ;;  %vm35_vm0 = vcmask 1041408   ;;  %v32_v0 = vld [vmem:[#allocation3] sm:$0xff]  ;;  %v33_v1 = vld [vmem:[#allocation3 + $0x8] sm:$0x3]  ;;  %v61_v10 = vlaneseq }
   0xf   :  { %v36_v2 = vsel %vm35_vm0, %v33_v1, -inf  ;;  %v34_v17 = vld [vmem:[%s200_s1] sm:$0x1]  ;;  %v170_v43 = vmov 0.0   ;;  %vm86_vm4 = vcmask 1040384   ;;  %s171_s18 = smov [#allocation6]  }
  0x10   :  { %v37_v3 = vmax.f32 %v32_v0, %v36_v2  ;;  %v62_v15 = vshrl.u32 %v61_v10, 7  ;;  %vm80_vm3 = vcmp.ge.s32.totalorder %v34_v17, 0 }
  0x11   :  { %v121_v44 = vsel %vm80_vm3, 1.0, %v170_v43 }
  0x12   :  { %v38_v4 = vrot.slane %v37_v3, 4  ;;  %v66_v16 = vsub.s32 0, %v62_v15  ;;  %v63_v18 = vadd.s32 8, %v62_v15 }
  0x14   :  { %v39_v5 = vmax.f32 %v37_v3, %v38_v4  ;;  %v67_v19 = vrot.slane %v34_v17, %v66_v16 }
  0x16   :  { %v40_v6 = vrot.slane %v39_v5, 2  ;;  %vm69_vm1 = vcmp.eq.s32.totalorder %v63_v18, %v67_v19  ;;  %vm68_vm2 = vcmp.eq.s32.totalorder %v62_v15, %v67_v19 }
  0x17   :  { %v71_v22 = vsel %vm69_vm1, %v33_v1, 0.0  ;;  %v70_v25 = vsel %vm68_vm2, %v32_v0, 0.0 }
  0x18   :  { %v41_v7 = vmax.f32 %v39_v5, %v40_v6  ;;  %v72_v26 = vsel %vm35_vm0, %v71_v22, 0.0 }
  0x19   :  { %v73_v29 = vadd.f32 %v72_v26, %v70_v25 }
  0x1a   :  { %v42_v8 = vrot.slane %v41_v7, 1 }
  0x1b   :  { %v74_v32 = vrot.slane %v73_v29, 4 }
  0x1c   :  { %v43_v9 = vmax.f32 %v41_v7, %v42_v8 }
  0x1d   :  { %v75_v35 = vadd.f32 %v74_v32, %v73_v29 }
  0x1e   :  { %v44_v11 = vsub.f32 %v32_v0, %v43_v9  ;;  %v45_v12 = vsub.f32 %v33_v1, %v43_v9 }
  0x1f   :  { %v76_v36 = vrot.slane %v75_v35, 2 }
  0x20   :  { %v46_v13 = vmul.f32 1.442695, %v44_v11  ;;  %v48_v14 = vmul.f32 1.442695, %v45_v12 }
  0x21   :  { %v77_v37 = vadd.f32 %v76_v36, %v75_v35 }
  0x22   :  { %129 = vpow2.f32 %v46_v13 }
  0x23   :  { %131 = vpow2.f32 %v48_v14  ;;  %v78_v38 = vrot.slane %v77_v37, 1 }
  0x25   :  { %v79_v41 = vadd.f32 %v78_v38, %v77_v37 }
  0x2f   :  { %v130_v20 = vpop.eup %129 }
  0x30   :  { %v132_v21 = vpop.eup %131 }
  0x31   :  { %v50_v23 = vsel %vm35_vm0, %v132_v21, 0.0 }
  0x32   :  { %v51_v24 = vadd.f32 %v130_v20, %v50_v23 }
  0x34   :  { %v52_v27 = vrot.slane %v51_v24, 4 }
  0x36   :  { %v53_v28 = vadd.f32 %v52_v27, %v51_v24 }
  0x38   :  { %v54_v30 = vrot.slane %v53_v28, 2 }
  0x3a   :  { %v55_v31 = vadd.f32 %v54_v30, %v53_v28 }
  0x3c   :  { %v56_v33 = vrot.slane %v55_v31, 1 }
  0x3e   :  { %v57_v34 = vadd.f32 %v56_v33, %v55_v31 }
  0x40   :  { %133 = vlog2.f32 %v57_v34 }
  0x4d   :  { %v134_v39 = vpop.eup %133 }
  0x4e   :  { %v59_v40 = vmul.f32 0.6931472, %v134_v39 }
  0x50   :  { %v60_v42 = vadd.f32 %v59_v40, %v43_v9 }
  0x52   :  { %v84_v45 = vsub.f32 %v60_v42, %v79_v41 }
  0x54   :  { %v85_v46 = vmul.f32 %v121_v44, %v84_v45 }
  0x56   :  { %v87_v47 = vsel %vm86_vm4, %v85_v46, 0.0 }
  0x57   :  { %88 = vadd.xlane.f32.xlu0 %v87_v47 }
  0xe0   :  { %v89_v48 = vpop.xlane.xlu0 %88 }
  0xe1   :  { %v90_v49 = vrot.slane %v89_v48, 4 }
  0xe3   :  { %v91_v50 = vadd.f32 %v90_v49, %v89_v48 }
  0xe5   :  { %v92_v51 = vrot.slane %v91_v50, 2 }
  0xe7   :  { %v93_v52 = vadd.f32 %v92_v51, %v91_v50 }
  0xe9   :  { %v94_v53 = vrot.slane %v93_v52, 1 }
  0xeb   :  { %v95_v54 = vadd.f32 %v94_v53, %v93_v52 }
  0xed   :  { %122 = vpush %v95_v54 }
 0x11e   :  { %s123_s1 = spop %122 }
 0x11f   :  { %s104_s17 = smul.f32 0.125, %s123_s1 }
 0x121   :  { %106 = sst [smem:[#allocation6]] %s104_s17 }
 0x122   :  { %114 = dma.smem_to_hbm %s171_s18, 16, %s201_s2, [#allocation5]  }
 0x123   :  { %165 = dma.done.wait [#allocation5], 16  }
 0x124   :  { %166 = vsyncadd [#allocation5], 4294967280 }
 0x125   :  { %118 = sfence }
 0x126   :  { %119 = vsyncpa [#allocation4], 1 }
 0x127   :  { %120 = vsyncpa [#allocation5], 1 }

</bundles_post_ra>
